<compile_context>
chip_gen: v7x
topology: tpu7x:2x2x1
jax: 0.10.0
libtpu: 0.0.40
codegen_flags: <defaults>
</compile_context>

<pallas_src>
import jax
import jax.numpy as jnp
from jax import lax
from jax.experimental import pallas as pl
from jax.experimental.pallas import tpu as pltpu


def bottleneck_lstm_seq_kernel(
    x_ref, c0_ref, h0_ref,
    wx_ref, bx_ref,
    wbx_ref, wbh_ref, bb_ref,
    wg_ref, bg_ref,
    wi_ref, bi_ref,
    ct_ref, ht_ref,
    c_state, h_state,
):
    t = pl.program_id(1)                       # time step (recurrent axis)
    Hp, Wp, Cin = x_ref.shape                  # x is zero-padded (H+2, W+2)
    H, W = Hp - 2, Wp - 2
    S = H * W
    Cout = c_state.shape[-1]
    gstride = wg_ref.shape[-1] // 3            # per-gate lane-tile stride (128-aligned)

    # Load the recurrent state from c0/h0 on the first timestep of each batch
    # element; afterwards it lives purely in VMEM scratch.
    @pl.when(t == 0)
    def _():
        c_state[...] = c0_ref[...]
        h_state[...] = h0_ref[...]

    x = x_ref[...]                             # (H+2, W+2, Cin)
    wx = wx_ref[...]                           # (9, Cin) depthwise taps

    # conv_x: depthwise 3x3, stride 1, padding 1 (input pre-padded).
    # Unrolled VPU tap sum, initialized from tap 0 (saves one full add).
    hx = x[0:H, 0:W, :] * wx[0:1, :].reshape(1, 1, Cin)
    for ky in range(3):
        for kx in range(3):
            tap = ky * 3 + kx
            if tap == 0:
                continue
            hx = hx + x[ky:ky + H, kx:kx + W, :] * wx[tap:tap + 1, :].reshape(1, 1, Cin)
    hx = hx + bx_ref[...].reshape(1, 1, Cin)
    hx2 = hx.reshape(S, Cin)                   # channels on the lane axis

    h_prev = h_state[...]                      # (S, Cout)
    c_prev = c_state[...]

    # conv_bottleneck: 1x1 conv over concat([h_x, h]) == split matmul
    # (keeps both operands tile-aligned; avoids a minor-dim concat).
    hb = (
        jnp.dot(hx2, wbx_ref[...], preferred_element_type=jnp.float32)
        + jnp.dot(h_prev, wbh_ref[...], preferred_element_type=jnp.float32)
        + bb_ref[...]
    )                                          # (S, Cout)

    # forget / candidate / output gates fused into ONE MXU matmul.  Each gate
    # sits on its own 128-lane tile of wg/bg, so the slices below start at
    # lane offsets 0, 128, 256 (vreg-aligned).
    g = jnp.dot(hb, wg_ref[...], preferred_element_type=jnp.float32) + bg_ref[...]
    c1 = jax.nn.sigmoid(g[:, 0:Cout])                         # forget gate
    hc = g[:, gstride:gstride + Cout]                         # candidate (self.conv)
    ho = g[:, 2 * gstride:2 * gstride + Cout]                 # output gate

    # conv_inputgate: depthwise 3x3, padding 0 -> full 3x3 spatial reduction
    # (valid only for H == W == 3; asserted in the wrapper).
    hi = jax.nn.sigmoid(
        jnp.sum(hb * wi_ref[...], axis=0, keepdims=True) + bi_ref[...]
    )                                          # (1, Cout), broadcast over H*W

    c_t = c_prev * c1 + hi * hc
    h_t = jnp.maximum(ho, 0.0) * c_t

    c_state[...] = c_t                         # carry state in VMEM
    h_state[...] = h_t
    ct_ref[...] = c_t                          # stream per-step outputs
    ht_ref[...] = h_t


def bottleneck_lstm_sequence(xs_nchw, c0_nchw, h0_nchw, params):
    """Run T recurrent forward() steps in one fused pallas_call.

    xs: (T, B, Cin, H, W); c0/h0: (B, Cout, H, W)   (all NCHW, float32)
    Returns (cs, hs): each (T, B, Cout, H, W) — the per-step (c_t, h_t).
    """
    T, B, Cin, H, W = xs_nchw.shape
    Cout = c0_nchw.shape[1]
    assert H == 3 and W == 3, (
        "conv_inputgate is an unpadded 3x3 depthwise conv whose 1x1 output is "
        "multiplied against full-resolution tensors; the module only runs for "
        "3x3 spatial inputs.")
    S = H * W
    GP = 128                                   # per-gate lane-tile stride

    # One-time (per sequence) relayout: NCHW -> NHWC + zero halo for conv_x.
    x = jnp.transpose(xs_nchw, (0, 1, 3, 4, 2)).astype(jnp.float32)
    xp = jnp.pad(x, ((0, 0), (0, 0), (1, 1), (1, 1), (0, 0)))   # (T,B,H+2,W+2,Cin)
    c0 = jnp.transpose(c0_nchw, (0, 2, 3, 1)).reshape(B, S, Cout).astype(jnp.float32)
    h0 = jnp.transpose(h0_nchw, (0, 2, 3, 1)).reshape(B, S, Cout).astype(jnp.float32)

    # PyTorch conv weights -> kernel layouts (one-time, amortized over T).
    wx = jnp.transpose(params["wx"][:, 0], (1, 2, 0)).reshape(9, Cin)    # taps x Cin
    bx = params["bx"].reshape(1, Cin)
    wb_t = params["wb"][:, :, 0, 0].T                                    # (Cin+Cout, Cout)
    wbx, wbh = wb_t[:Cin], wb_t[Cin:]
    bb = params["bb"].reshape(1, Cout)
    # Fused forget/candidate/output gate weights: each gate on its own
    # 128-lane tile so the in-kernel slices are vreg-aligned.
    wg = jnp.zeros((Cout, 3 * GP), jnp.float32)
    bg = jnp.zeros((1, 3 * GP), jnp.float32)
    for k, (wk, bk) in enumerate((("wf", "bf"), ("wc", "bc"), ("wo", "bo"))):
        wg = wg.at[:, k * GP:k * GP + Cout].set(params[wk][:, :, 0, 0].T)
        bg = bg.at[:, k * GP:k * GP + Cout].set(params[bk].reshape(1, Cout))
    wi = jnp.transpose(params["wi"][:, 0], (1, 2, 0)).reshape(9, Cout)   # taps x Cout
    bi = params["bi"].reshape(1, Cout)

    def const_spec(shape):
        # Constant block index across the whole grid -> DMA'd once, stays in VMEM.
        return pl.BlockSpec(shape, lambda b, t: (0,) * len(shape))

    grid_spec = pltpu.PrefetchScalarGridSpec(
        num_scalar_prefetch=0,
        grid=(B, T),                    # batch parallel (v7x megacore), time recurrent
        in_specs=[
            pl.BlockSpec((None, None, H + 2, W + 2, Cin),
                         lambda b, t: (t, b, 0, 0, 0)),                  # x_t (per step)
            pl.BlockSpec((None, S, Cout), lambda b, t: (b, 0, 0)),       # c0
            pl.BlockSpec((None, S, Cout), lambda b, t: (b, 0, 0)),       # h0
            const_spec((9, Cin)), const_spec((1, Cin)),                  # wx, bx
            const_spec((Cin, Cout)), const_spec((Cout, Cout)),           # wbx, wbh
            const_spec((1, Cout)),                                       # bb
            const_spec((Cout, 3 * GP)), const_spec((1, 3 * GP)),         # wg, bg (fused gates)
            const_spec((9, Cout)), const_spec((1, Cout)),                # wi, bi
        ],
        out_specs=[
            pl.BlockSpec((None, None, S, Cout), lambda b, t: (t, b, 0, 0)),   # c_t
            pl.BlockSpec((None, None, S, Cout), lambda b, t: (t, b, 0, 0)),   # h_t
        ],
        scratch_shapes=[
            pltpu.VMEM((S, Cout), jnp.float32),    # carried cell state
            pltpu.VMEM((S, Cout), jnp.float32),    # carried hidden state
        ],
    )

    cs, hs = pl.pallas_call(
        bottleneck_lstm_seq_kernel,
        out_shape=(
            jax.ShapeDtypeStruct((T, B, S, Cout), jnp.float32),
            jax.ShapeDtypeStruct((T, B, S, Cout), jnp.float32),
        ),
        grid_spec=grid_spec,
        compiler_params=pltpu.CompilerParams(
            dimension_semantics=("parallel", "arbitrary")),
    )(xp, c0, h0, wx, bx, wbx, wbh, bb, wg, bg, wi, bi)

    cs = jnp.transpose(cs.reshape(T, B, H, W, Cout), (0, 1, 4, 2, 3))
    hs = jnp.transpose(hs.reshape(T, B, H, W, Cout), (0, 1, 4, 2, 3))
    return cs, hs


def init_params(key, cin, cout):
    """Deterministic synthetic weights, PyTorch Conv2d shapes (O, I/groups, kH, kW)."""
    ks = jax.random.split(key, 12)
    n = lambda k, shp: 0.1 * jax.random.normal(k, shp, jnp.float32)
    return {
        "wx": n(ks[0], (cin, 1, 3, 3)),           "bx": n(ks[1], (cin,)),
        "wb": n(ks[2], (cout, cin + cout, 1, 1)), "bb": n(ks[3], (cout,)),
        "wf": n(ks[4], (cout, cout, 1, 1)),       "bf": n(ks[5], (cout,)),
        "wi": n(ks[6], (cout, 1, 3, 3)),          "bi": n(ks[7], (cout,)),
        "wc": n(ks[8], (cout, cout, 1, 1)),       "bc": n(ks[9], (cout,)),
        "wo": n(ks[10], (cout, cout, 1, 1)),      "bo": n(ks[11], (cout,)),
    }


def reference_forward(x, c, h, p):
    """Pure-JAX replica of BottleneckLSTM.cell_forward (NCHW, PyTorch conv semantics)."""
    dn = ("NCHW", "OIHW", "NCHW")
    cin, cout = x.shape[1], c.shape[1]

    def conv(inp, w, b, pad, groups):
        out = lax.conv_general_dilated(
            inp, w, window_strides=(1, 1), padding=[(pad, pad), (pad, pad)],
            dimension_numbers=dn, feature_group_count=groups)
        return out + b[None, :, None, None]

    h_x = conv(x, p["wx"], p["bx"], 1, cin)
    h_b = conv(jnp.concatenate([h_x, h], axis=1), p["wb"], p["bb"], 0, 1)
    c_1 = jax.nn.sigmoid(conv(h_b, p["wf"], p["bf"], 0, 1))
    h_i = jax.nn.sigmoid(conv(h_b, p["wi"], p["bi"], 0, cout))
    h_c = conv(h_b, p["wc"], p["bc"], 0, 1)
    h_o = conv(h_b, p["wo"], p["bo"], 0, 1)
    c_2 = h_i * h_c
    c_t = c * c_1 + c_2
    h_t = jnp.maximum(h_o, 0.0) * c_t
    return c_t, h_t


if __name__ == "__main__":
    key = jax.random.PRNGKey(0)
    B, Cin, Cout, T = 2, 4, 32, 8
    H = W = 3  # required by the module's unpadded 3x3 conv_inputgate (see NOTE above)

    kp, kx = jax.random.split(key)
    params = init_params(kp, Cin, Cout)

    # module.init_state(): zero c / h with out_channel channels (NCHW)
    c0 = jnp.zeros((B, Cout, H, W), jnp.float32)
    h0 = jnp.zeros((B, Cout, H, W), jnp.float32)

    # A whole input sequence; all T forward() steps run in ONE pallas_call.
    xs = jax.random.normal(kx, (T, B, Cin, H, W), jnp.float32)

    seq_fn = jax.jit(bottleneck_lstm_sequence)
    cs, hs = seq_fn(xs, c0, h0, params)
    jax.block_until_ready((cs, hs))

    # Pure-JAX reference: thread the recurrent (self.c, self.h) state step by step.
    c_r, h_r = c0, h0
    for t in range(T):
        c_r, h_r = reference_forward(xs[t], c_r, h_r, params)
        assert jnp.allclose(cs[t], c_r, atol=5e-4, rtol=5e-4), f"c_t mismatch at t={t}"
        assert jnp.allclose(hs[t], h_r, atol=5e-4, rtol=5e-4), f"h_t mismatch at t={t}"

    print("KERNEL_OK")
</pallas_src>

<mosaic_0001>
module attributes {stable_mosaic.version = 11 : i64} {
  func.func @bottleneck_lstm_seq_kernel(%arg0: i32, %arg1: i32, %arg2: memref<1x1x5x5x4xf32, #tpu.memory_space<vmem>>, %arg3: memref<1x9x32xf32, #tpu.memory_space<vmem>>, %arg4: memref<1x9x32xf32, #tpu.memory_space<vmem>>, %arg5: memref<9x4xf32, #tpu.memory_space<vmem>>, %arg6: memref<1x4xf32, #tpu.memory_space<vmem>>, %arg7: memref<4x32xf32, #tpu.memory_space<vmem>>, %arg8: memref<32x32xf32, #tpu.memory_space<vmem>>, %arg9: memref<1x32xf32, #tpu.memory_space<vmem>>, %arg10: memref<32x384xf32, #tpu.memory_space<vmem>>, %arg11: memref<1x384xf32, #tpu.memory_space<vmem>>, %arg12: memref<9x32xf32, #tpu.memory_space<vmem>>, %arg13: memref<1x32xf32, #tpu.memory_space<vmem>>, %arg14: memref<1x1x9x32xf32, #tpu.memory_space<vmem>>, %arg15: memref<1x1x9x32xf32, #tpu.memory_space<vmem>>, %arg16: memref<9x32xf32, #tpu.memory_space<vmem>>, %arg17: memref<9x32xf32, #tpu.memory_space<vmem>>) attributes {dimension_semantics = [#tpu.dimension_semantics<parallel>, #tpu.dimension_semantics<arbitrary>], iteration_bounds = array<i64: 2, 8>, scalar_prefetch = 0 : i64, scratch_operands = 2 : i64, tpu.core_type = #tpu.core_type<tc>, window_params = [{transform_indices = @transform_0, window_bounds = array<i64: 1, 1, 5, 5, 4>}, {transform_indices = @transform_1, window_bounds = array<i64: 1, 9, 32>}, {transform_indices = @transform_2, window_bounds = array<i64: 1, 9, 32>}, {pipeline_mode = #tpu.pipeline_mode<synchronous>, transform_indices = @transform_3, window_bounds = array<i64: 9, 4>}, {pipeline_mode = #tpu.pipeline_mode<synchronous>, transform_indices = @transform_4, window_bounds = array<i64: 1, 4>}, {pipeline_mode = #tpu.pipeline_mode<synchronous>, transform_indices = @transform_5, window_bounds = array<i64: 4, 32>}, {pipeline_mode = #tpu.pipeline_mode<synchronous>, transform_indices = @transform_6, window_bounds = array<i64: 32, 32>}, {pipeline_mode = #tpu.pipeline_mode<synchronous>, transform_indices = @transform_7, window_bounds = array<i64: 1, 32>}, {pipeline_mode = #tpu.pipeline_mode<synchronous>, transform_indices = @transform_8, window_bounds = array<i64: 32, 384>}, {pipeline_mode = #tpu.pipeline_mode<synchronous>, transform_indices = @transform_9, window_bounds = array<i64: 1, 384>}, {pipeline_mode = #tpu.pipeline_mode<synchronous>, transform_indices = @transform_10, window_bounds = array<i64: 9, 32>}, {pipeline_mode = #tpu.pipeline_mode<synchronous>, transform_indices = @transform_11, window_bounds = array<i64: 1, 32>}, {transform_indices = @transform_12, window_bounds = array<i64: 1, 1, 9, 32>}, {transform_indices = @transform_13, window_bounds = array<i64: 1, 1, 9, 32>}]} {
    %c0_i32 = arith.constant 0 : i32
    %0 = arith.cmpi eq, %arg1, %c0_i32 : i32
    %1 = arith.extui %0 : i1 to i32
    %c0_i32_0 = arith.constant 0 : i32
    %2 = arith.cmpi ne, %1, %c0_i32_0 : i32
    scf.if %2 {
      %c0_45 = arith.constant 0 : index
      %c0_46 = arith.constant 0 : index
      %c0_47 = arith.constant 0 : index
      %113 = vector.load %arg3[%c0_45, %c0_46, %c0_47] : memref<1x9x32xf32, #tpu.memory_space<vmem>>, vector<1x9x32xf32>
      %114 = vector.shape_cast %113 : vector<1x9x32xf32> to vector<9x32xf32>
      %c0_48 = arith.constant 0 : index
      %c0_49 = arith.constant 0 : index
      %115 = vector.load %arg16[%c0_48, %c0_49] : memref<9x32xf32, #tpu.memory_space<vmem>>, vector<9x32xf32>
      tpu.vector_store %arg16[%c0_48, %c0_49], %114 {strides = array<i32>} : memref<9x32xf32, #tpu.memory_space<vmem>>, vector<9x32xf32>,
      %c0_50 = arith.constant 0 : index
      %c0_51 = arith.constant 0 : index
      %c0_52 = arith.constant 0 : index
      %116 = vector.load %arg4[%c0_50, %c0_51, %c0_52] : memref<1x9x32xf32, #tpu.memory_space<vmem>>, vector<1x9x32xf32>
      %117 = vector.shape_cast %116 : vector<1x9x32xf32> to vector<9x32xf32>
      %c0_53 = arith.constant 0 : index
      %c0_54 = arith.constant 0 : index
      %118 = vector.load %arg17[%c0_53, %c0_54] : memref<9x32xf32, #tpu.memory_space<vmem>>, vector<9x32xf32>
      tpu.vector_store %arg17[%c0_53, %c0_54], %117 {strides = array<i32>} : memref<9x32xf32, #tpu.memory_space<vmem>>, vector<9x32xf32>,
    } else {
    }
    %c0 = arith.constant 0 : index
    %c0_1 = arith.constant 0 : index
    %c0_2 = arith.constant 0 : index
    %c0_3 = arith.constant 0 : index
    %c0_4 = arith.constant 0 : index
    %3 = vector.load %arg2[%c0, %c0_1, %c0_2, %c0_3, %c0_4] : memref<1x1x5x5x4xf32, #tpu.memory_space<vmem>>, vector<1x1x5x5x4xf32>
    %4 = vector.shape_cast %3 : vector<1x1x5x5x4xf32> to vector<5x5x4xf32>
    %c0_5 = arith.constant 0 : index
    %c0_6 = arith.constant 0 : index
    %5 = vector.load %arg5[%c0_5, %c0_6] : memref<9x4xf32, #tpu.memory_space<vmem>>, vector<9x4xf32>
    %6 = vector.extract_strided_slice %4 {offsets = [0, 0, 0], sizes = [3, 3, 4], strides = [1, 1, 1]} : vector<5x5x4xf32> to vector<3x3x4xf32>
    %7 = vector.extract_strided_slice %5 {offsets = [0, 0], sizes = [1, 4], strides = [1, 1]} : vector<9x4xf32> to vector<1x4xf32>
    %8 = vector.shape_cast %7 : vector<1x4xf32> to vector<1x1x4xf32>
    %9 = vector.broadcast %8 : vector<1x1x4xf32> to vector<3x3x4xf32>
    %10 = arith.mulf %6, %9 : vector<3x3x4xf32>
    %11 = vector.extract_strided_slice %4 {offsets = [0, 1, 0], sizes = [3, 3, 4], strides = [1, 1, 1]} : vector<5x5x4xf32> to vector<3x3x4xf32>
    %12 = vector.extract_strided_slice %5 {offsets = [1, 0], sizes = [1, 4], strides = [1, 1]} : vector<9x4xf32> to vector<1x4xf32>
    %13 = vector.shape_cast %12 : vector<1x4xf32> to vector<1x1x4xf32>
    %14 = vector.broadcast %13 : vector<1x1x4xf32> to vector<3x3x4xf32>
    %15 = arith.mulf %11, %14 : vector<3x3x4xf32>
    %16 = arith.addf %10, %15 : vector<3x3x4xf32>
    %17 = vector.extract_strided_slice %4 {offsets = [0, 2, 0], sizes = [3, 3, 4], strides = [1, 1, 1]} : vector<5x5x4xf32> to vector<3x3x4xf32>
    %18 = vector.extract_strided_slice %5 {offsets = [2, 0], sizes = [1, 4], strides = [1, 1]} : vector<9x4xf32> to vector<1x4xf32>
    %19 = vector.shape_cast %18 : vector<1x4xf32> to vector<1x1x4xf32>
    %20 = vector.broadcast %19 : vector<1x1x4xf32> to vector<3x3x4xf32>
    %21 = arith.mulf %17, %20 : vector<3x3x4xf32>
    %22 = arith.addf %16, %21 : vector<3x3x4xf32>
    %23 = vector.extract_strided_slice %4 {offsets = [1, 0, 0], sizes = [3, 3, 4], strides = [1, 1, 1]} : vector<5x5x4xf32> to vector<3x3x4xf32>
    %24 = vector.extract_strided_slice %5 {offsets = [3, 0], sizes = [1, 4], strides = [1, 1]} : vector<9x4xf32> to vector<1x4xf32>
    %25 = vector.shape_cast %24 : vector<1x4xf32> to vector<1x1x4xf32>
    %26 = vector.broadcast %25 : vector<1x1x4xf32> to vector<3x3x4xf32>
    %27 = arith.mulf %23, %26 : vector<3x3x4xf32>
    %28 = arith.addf %22, %27 : vector<3x3x4xf32>
    %29 = vector.extract_strided_slice %4 {offsets = [1, 1, 0], sizes = [3, 3, 4], strides = [1, 1, 1]} : vector<5x5x4xf32> to vector<3x3x4xf32>
    %30 = vector.extract_strided_slice %5 {offsets = [4, 0], sizes = [1, 4], strides = [1, 1]} : vector<9x4xf32> to vector<1x4xf32>
    %31 = vector.shape_cast %30 : vector<1x4xf32> to vector<1x1x4xf32>
    %32 = vector.broadcast %31 : vector<1x1x4xf32> to vector<3x3x4xf32>
    %33 = arith.mulf %29, %32 : vector<3x3x4xf32>
    %34 = arith.addf %28, %33 : vector<3x3x4xf32>
    %35 = vector.extract_strided_slice %4 {offsets = [1, 2, 0], sizes = [3, 3, 4], strides = [1, 1, 1]} : vector<5x5x4xf32> to vector<3x3x4xf32>
    %36 = vector.extract_strided_slice %5 {offsets = [5, 0], sizes = [1, 4], strides = [1, 1]} : vector<9x4xf32> to vector<1x4xf32>
    %37 = vector.shape_cast %36 : vector<1x4xf32> to vector<1x1x4xf32>
    %38 = vector.broadcast %37 : vector<1x1x4xf32> to vector<3x3x4xf32>
    %39 = arith.mulf %35, %38 : vector<3x3x4xf32>
    %40 = arith.addf %34, %39 : vector<3x3x4xf32>
    %41 = vector.extract_strided_slice %4 {offsets = [2, 0, 0], sizes = [3, 3, 4], strides = [1, 1, 1]} : vector<5x5x4xf32> to vector<3x3x4xf32>
    %42 = vector.extract_strided_slice %5 {offsets = [6, 0], sizes = [1, 4], strides = [1, 1]} : vector<9x4xf32> to vector<1x4xf32>
    %43 = vector.shape_cast %42 : vector<1x4xf32> to vector<1x1x4xf32>
    %44 = vector.broadcast %43 : vector<1x1x4xf32> to vector<3x3x4xf32>
    %45 = arith.mulf %41, %44 : vector<3x3x4xf32>
    %46 = arith.addf %40, %45 : vector<3x3x4xf32>
    %47 = vector.extract_strided_slice %4 {offsets = [2, 1, 0], sizes = [3, 3, 4], strides = [1, 1, 1]} : vector<5x5x4xf32> to vector<3x3x4xf32>
    %48 = vector.extract_strided_slice %5 {offsets = [7, 0], sizes = [1, 4], strides = [1, 1]} : vector<9x4xf32> to vector<1x4xf32>
    %49 = vector.shape_cast %48 : vector<1x4xf32> to vector<1x1x4xf32>
    %50 = vector.broadcast %49 : vector<1x1x4xf32> to vector<3x3x4xf32>
    %51 = arith.mulf %47, %50 : vector<3x3x4xf32>
    %52 = arith.addf %46, %51 : vector<3x3x4xf32>
    %53 = vector.extract_strided_slice %4 {offsets = [2, 2, 0], sizes = [3, 3, 4], strides = [1, 1, 1]} : vector<5x5x4xf32> to vector<3x3x4xf32>
    %54 = vector.extract_strided_slice %5 {offsets = [8, 0], sizes = [1, 4], strides = [1, 1]} : vector<9x4xf32> to vector<1x4xf32>
    %55 = vector.shape_cast %54 : vector<1x4xf32> to vector<1x1x4xf32>
    %56 = vector.broadcast %55 : vector<1x1x4xf32> to vector<3x3x4xf32>
    %57 = arith.mulf %53, %56 : vector<3x3x4xf32>
    %58 = arith.addf %52, %57 : vector<3x3x4xf32>
    %c0_7 = arith.constant 0 : index
    %c0_8 = arith.constant 0 : index
    %59 = vector.load %arg6[%c0_7, %c0_8] : memref<1x4xf32, #tpu.memory_space<vmem>>, vector<1x4xf32>
    %60 = vector.shape_cast %59 : vector<1x4xf32> to vector<1x1x4xf32>
    %61 = vector.broadcast %60 : vector<1x1x4xf32> to vector<3x3x4xf32>
    %62 = arith.addf %58, %61 : vector<3x3x4xf32>
    %63 = vector.shape_cast %62 : vector<3x3x4xf32> to vector<9x4xf32>
    %c0_9 = arith.constant 0 : index
    %c0_10 = arith.constant 0 : index
    %64 = vector.load %arg17[%c0_9, %c0_10] : memref<9x32xf32, #tpu.memory_space<vmem>>, vector<9x32xf32>
    %c0_11 = arith.constant 0 : index
    %c0_12 = arith.constant 0 : index
    %65 = vector.load %arg16[%c0_11, %c0_12] : memref<9x32xf32, #tpu.memory_space<vmem>>, vector<9x32xf32>
    %c0_13 = arith.constant 0 : index
    %c0_14 = arith.constant 0 : index
    %66 = vector.load %arg7[%c0_13, %c0_14] : memref<4x32xf32, #tpu.memory_space<vmem>>, vector<4x32xf32>
    %cst = arith.constant dense<0.000000e+00> : vector<9x32xf32>
    %67 = tpu.matmul %63, %66, %cst {dimension_numbers = #tpu.dot_dimension_numbers<[1], [0], [0], [1], [0, 0, 1, 1], [], []>} : vector<9x4xf32>, vector<4x32xf32>, vector<9x32xf32> -> vector<9x32xf32>
    %c0_15 = arith.constant 0 : index
    %c0_16 = arith.constant 0 : index
    %68 = vector.load %arg8[%c0_15, %c0_16] : memref<32x32xf32, #tpu.memory_space<vmem>>, vector<32x32xf32>
    %cst_17 = arith.constant dense<0.000000e+00> : vector<9x32xf32>
    %69 = tpu.matmul %64, %68, %cst_17 {dimension_numbers = #tpu.dot_dimension_numbers<[1], [0], [0], [1], [0, 0, 1, 1], [], []>} : vector<9x32xf32>, vector<32x32xf32>, vector<9x32xf32> -> vector<9x32xf32>
    %70 = arith.addf %67, %69 : vector<9x32xf32>
    %c0_18 = arith.constant 0 : index
    %c0_19 = arith.constant 0 : index
    %71 = vector.load %arg9[%c0_18, %c0_19] : memref<1x32xf32, #tpu.memory_space<vmem>>, vector<1x32xf32>
    %72 = vector.broadcast %71 : vector<1x32xf32> to vector<9x32xf32>
    %73 = arith.addf %70, %72 : vector<9x32xf32>
    %c0_20 = arith.constant 0 : index
    %c0_21 = arith.constant 0 : index
    %74 = vector.load %arg10[%c0_20, %c0_21] : memref<32x384xf32, #tpu.memory_space<vmem>>, vector<32x384xf32>
    %cst_22 = arith.constant dense<0.000000e+00> : vector<9x384xf32>
    %75 = tpu.matmul %73, %74, %cst_22 {dimension_numbers = #tpu.dot_dimension_numbers<[1], [0], [0], [1], [0, 0, 1, 1], [], []>} : vector<9x32xf32>, vector<32x384xf32>, vector<9x384xf32> -> vector<9x384xf32>
    %c0_23 = arith.constant 0 : index
    %c0_24 = arith.constant 0 : index
    %76 = vector.load %arg11[%c0_23, %c0_24] : memref<1x384xf32, #tpu.memory_space<vmem>>, vector<1x384xf32>
    %77 = vector.broadcast %76 : vector<1x384xf32> to vector<9x384xf32>
    %78 = arith.addf %75, %77 : vector<9x384xf32>
    %79 = vector.extract_strided_slice %78 {offsets = [0, 0], sizes = [9, 32], strides = [1, 1]} : vector<9x384xf32> to vector<9x32xf32>
    %80 = arith.negf %79 : vector<9x32xf32>
    %81 = math.exp %80 : vector<9x32xf32>
    %cst_25 = arith.constant 1.000000e+00 : f32
    %82 = vector.broadcast %cst_25 : f32 to vector<9x32xf32>
    %83 = arith.addf %82, %81 : vector<9x32xf32>
    %84 = arith.divf %82, %83 : vector<9x32xf32>
    %85 = vector.extract_strided_slice %78 {offsets = [0, 128], sizes = [9, 32], strides = [1, 1]} : vector<9x384xf32> to vector<9x32xf32>
    %86 = vector.extract_strided_slice %78 {offsets = [0, 256], sizes = [9, 32], strides = [1, 1]} : vector<9x384xf32> to vector<9x32xf32>
    %c0_26 = arith.constant 0 : index
    %c0_27 = arith.constant 0 : index
    %87 = vector.load %arg12[%c0_26, %c0_27] : memref<9x32xf32, #tpu.memory_space<vmem>>, vector<9x32xf32>
    %88 = arith.mulf %73, %87 : vector<9x32xf32>
    %cst_28 = arith.constant dense<0.000000e+00> : vector<32xf32>
    %89 = vector.multi_reduction <add>, %88, %cst_28 [0] : vector<9x32xf32> to vector<32xf32>
    %90 = vector.shape_cast %89 : vector<32xf32> to vector<1x32xf32>
    %c0_29 = arith.constant 0 : index
    %c0_30 = arith.constant 0 : index
    %91 = vector.load %arg13[%c0_29, %c0_30] : memref<1x32xf32, #tpu.memory_space<vmem>>, vector<1x32xf32>
    %92 = arith.addf %90, %91 : vector<1x32xf32>
    %93 = arith.negf %92 : vector<1x32xf32>
    %94 = math.exp %93 : vector<1x32xf32>
    %cst_31 = arith.constant 1.000000e+00 : f32
    %95 = vector.broadcast %cst_31 : f32 to vector<1x32xf32>
    %96 = arith.addf %95, %94 : vector<1x32xf32>
    %97 = arith.divf %95, %96 : vector<1x32xf32>
    %98 = arith.mulf %65, %84 : vector<9x32xf32>
    %99 = vector.broadcast %97 : vector<1x32xf32> to vector<9x32xf32>
    %100 = arith.mulf %99, %85 : vector<9x32xf32>
    %101 = arith.addf %98, %100 : vector<9x32xf32>
    %cst_32 = arith.constant 0.000000e+00 : f32
    %102 = vector.broadcast %cst_32 : f32 to vector<9x32xf32>
    %103 = arith.maximumf %86, %102 : vector<9x32xf32>
    %104 = arith.mulf %103, %101 : vector<9x32xf32>
    %c0_33 = arith.constant 0 : index
    %c0_34 = arith.constant 0 : index
    %105 = vector.load %arg16[%c0_33, %c0_34] : memref<9x32xf32, #tpu.memory_space<vmem>>, vector<9x32xf32>
    tpu.vector_store %arg16[%c0_33, %c0_34], %101 {strides = array<i32>} : memref<9x32xf32, #tpu.memory_space<vmem>>, vector<9x32xf32>,
    %c0_35 = arith.constant 0 : index
    %c0_36 = arith.constant 0 : index
    %106 = vector.load %arg17[%c0_35, %c0_36] : memref<9x32xf32, #tpu.memory_space<vmem>>, vector<9x32xf32>
    tpu.vector_store %arg17[%c0_35, %c0_36], %104 {strides = array<i32>} : memref<9x32xf32, #tpu.memory_space<vmem>>, vector<9x32xf32>,
    %c0_37 = arith.constant 0 : index
    %c0_38 = arith.constant 0 : index
    %c0_39 = arith.constant 0 : index
    %c0_40 = arith.constant 0 : index
    %107 = vector.load %arg14[%c0_37, %c0_38, %c0_39, %c0_40] : memref<1x1x9x32xf32, #tpu.memory_space<vmem>>, vector<1x1x9x32xf32>
    %108 = vector.shape_cast %107 : vector<1x1x9x32xf32> to vector<9x32xf32>
    %109 = vector.shape_cast %101 : vector<9x32xf32> to vector<1x1x9x32xf32>
    tpu.vector_store %arg14[%c0_37, %c0_38, %c0_39, %c0_40], %109 {strides = array<i32>} : memref<1x1x9x32xf32, #tpu.memory_space<vmem>>, vector<1x1x9x32xf32>,
    %c0_41 = arith.constant 0 : index
    %c0_42 = arith.constant 0 : index
    %c0_43 = arith.constant 0 : index
    %c0_44 = arith.constant 0 : index
    %110 = vector.load %arg15[%c0_41, %c0_42, %c0_43, %c0_44] : memref<1x1x9x32xf32, #tpu.memory_space<vmem>>, vector<1x1x9x32xf32>
    %111 = vector.shape_cast %110 : vector<1x1x9x32xf32> to vector<9x32xf32>
    %112 = vector.shape_cast %104 : vector<9x32xf32> to vector<1x1x9x32xf32>
    tpu.vector_store %arg15[%c0_41, %c0_42, %c0_43, %c0_44], %112 {strides = array<i32>} : memref<1x1x9x32xf32, #tpu.memory_space<vmem>>, vector<1x1x9x32xf32>,
    return
  }
  func.func @transform_0(%arg0: i32, %arg1: i32) -> (i32, i32, i32, i32, i32) {
    %c0_i32 = arith.constant 0 : i32
    %c0_i32_0 = arith.constant 0 : i32
    %c0_i32_1 = arith.constant 0 : i32
    %c0_i32_2 = arith.constant 0 : i32
    return %arg1, %arg0, %c0_i32, %c0_i32_0, %c0_i32_1 : i32, i32, i32, i32, i32
  }
  func.func @transform_1(%arg0: i32, %arg1: i32) -> (i32, i32, i32) {
    %c0_i32 = arith.constant 0 : i32
    %c0_i32_0 = arith.constant 0 : i32
    %c0_i32_1 = arith.constant 0 : i32
    return %arg0, %c0_i32, %c0_i32_0 : i32, i32, i32
  }
  func.func @transform_2(%arg0: i32, %arg1: i32) -> (i32, i32, i32) {
    %c0_i32 = arith.constant 0 : i32
    %c0_i32_0 = arith.constant 0 : i32
    %c0_i32_1 = arith.constant 0 : i32
    return %arg0, %c0_i32, %c0_i32_0 : i32, i32, i32
  }
  func.func @transform_3(%arg0: i32, %arg1: i32) -> (i32, i32) {
    %c0_i32 = arith.constant 0 : i32
    %c0_i32_0 = arith.constant 0 : i32
    %c0_i32_1 = arith.constant 0 : i32
    return %c0_i32, %c0_i32_0 : i32, i32
  }
  func.func @transform_4(%arg0: i32, %arg1: i32) -> (i32, i32) {
    %c0_i32 = arith.constant 0 : i32
    %c0_i32_0 = arith.constant 0 : i32
    %c0_i32_1 = arith.constant 0 : i32
    return %c0_i32, %c0_i32_0 : i32, i32
  }
  func.func @transform_5(%arg0: i32, %arg1: i32) -> (i32, i32) {
    %c0_i32 = arith.constant 0 : i32
    %c0_i32_0 = arith.constant 0 : i32
    %c0_i32_1 = arith.constant 0 : i32
    return %c0_i32, %c0_i32_0 : i32, i32
  }
  func.func @transform_6(%arg0: i32, %arg1: i32) -> (i32, i32) {
    %c0_i32 = arith.constant 0 : i32
    %c0_i32_0 = arith.constant 0 : i32
    %c0_i32_1 = arith.constant 0 : i32
    return %c0_i32, %c0_i32_0 : i32, i32
  }
  func.func @transform_7(%arg0: i32, %arg1: i32) -> (i32, i32) {
    %c0_i32 = arith.constant 0 : i32
    %c0_i32_0 = arith.constant 0 : i32
    %c0_i32_1 = arith.constant 0 : i32
    return %c0_i32, %c0_i32_0 : i32, i32
  }
  func.func @transform_8(%arg0: i32, %arg1: i32) -> (i32, i32) {
    %c0_i32 = arith.constant 0 : i32
    %c0_i32_0 = arith.constant 0 : i32
    %c0_i32_1 = arith.constant 0 : i32
    return %c0_i32, %c0_i32_0 : i32, i32
  }
  func.func @transform_9(%arg0: i32, %arg1: i32) -> (i32, i32) {
    %c0_i32 = arith.constant 0 : i32
    %c0_i32_0 = arith.constant 0 : i32
    %c0_i32_1 = arith.constant 0 : i32
    return %c0_i32, %c0_i32_0 : i32, i32
  }
  func.func @transform_10(%arg0: i32, %arg1: i32) -> (i32, i32) {
    %c0_i32 = arith.constant 0 : i32
    %c0_i32_0 = arith.constant 0 : i32
    %c0_i32_1 = arith.constant 0 : i32
    return %c0_i32, %c0_i32_0 : i32, i32
  }
  func.func @transform_11(%arg0: i32, %arg1: i32) -> (i32, i32) {
    %c0_i32 = arith.constant 0 : i32
    %c0_i32_0 = arith.constant 0 : i32
    %c0_i32_1 = arith.constant 0 : i32
    return %c0_i32, %c0_i32_0 : i32, i32
  }
  func.func @transform_12(%arg0: i32, %arg1: i32) -> (i32, i32, i32, i32) {
    %c0_i32 = arith.constant 0 : i32
    %c0_i32_0 = arith.constant 0 : i32
    %c0_i32_1 = arith.constant 0 : i32
    return %arg1, %arg0, %c0_i32, %c0_i32_0 : i32, i32, i32, i32
  }
  func.func @transform_13(%arg0: i32, %arg1: i32) -> (i32, i32, i32, i32) {
    %c0_i32 = arith.constant 0 : i32
    %c0_i32_0 = arith.constant 0 : i32
    %c0_i32_1 = arith.constant 0 : i32
    return %arg1, %arg0, %c0_i32, %c0_i32_0 : i32, i32, i32, i32
  }
}

</mosaic_0001>

<bundles_post_ra>
// kernel: bottleneck_lstm_sequence.1
= control target key start
LH: loop header
LB: loop body
LE: loop exit
PB: predicated region body
PF: predicated region fallthrough
CT: control target
= control target key end

     0   :  { %s1718_s25 = smov 0   ;;  %s1720_s26 = smov 0   ;;  %s1951_s0 = inlined_call_operand.vmem [shape: f32[8,2,5,5,4], index: 0, kind: input, shape index: {}]   ;;  %s1952_s1 = inlined_call_operand.vmem [shape: f32[2,9,32], index: 1, kind: input, shape index: {}]   ;;  %s1953_s2 = inlined_call_operand.vmem [shape: f32[2,9,32], index: 2, kind: input, shape index: {}]   ;;  %s1954_s3 = inlined_call_operand.vmem [shape: f32[9,4], index: 3, kind: input, shape index: {}]   ;;  %s1955_s4 = inlined_call_operand.vmem [shape: f32[1,4], index: 4, kind: input, shape index: {}]   ;;  %s1956_s5 = inlined_call_operand.vmem [shape: f32[4,32], index: 5, kind: input, shape index: {}]   ;;  %s1957_s6 = inlined_call_operand.vmem [shape: f32[32,32], index: 6, kind: input, shape index: {}]   ;;  %s1958_s7 = inlined_call_operand.vmem [shape: f32[1,32], index: 7, kind: input, shape index: {}]   ;;  %s1959_s8 = inlined_call_operand.vmem [shape: f32[32,384], index: 8, kind: input, shape index: {}]   ;;  %s1960_s9 = inlined_call_operand.vmem [shape: f32[1,384], index: 9, kind: input, shape index: {}]   ;;  %s1961_s10 = inlined_call_operand.vmem [shape: f32[9,32], index: 10, kind: input, shape index: {}]   ;;  %s1962_s11 = inlined_call_operand.vmem [shape: f32[1,32], index: 11, kind: input, shape index: {}]   ;;  %s1963_s12 = inlined_call_operand.vmem [shape: f32[8,2,9,32], index: 12, kind: output, shape index: {0}]   ;;  %s1964_s13 = inlined_call_operand.vmem [shape: f32[8,2,9,32], index: 13, kind: output, shape index: {1}]  }
   0x1   :  { %1970 = sst [smem:[#allocation9_spill]] %s1955_s4  ;;  %s1722_s27 = smov 0  }
   0x2   :  { %1971 = sst [smem:[#allocation10_spill]] %s1958_s7  ;;  %s1724_s28 = smov 0  }
   0x3   :  { %1972 = sst [smem:[#allocation11_spill]] %s1959_s8  ;;  %s1726_s29 = smov 0  }
   0x4   :  { %1973 = sst [smem:[#allocation12_spill]] %s1960_s9 }
   0x5   :  { %1974 = sst [smem:[#allocation13_spill]] %s1961_s10 }
   0x6   :  { %1975 = sst [smem:[#allocation14_spill]] %s1962_s11 }
   0x7 LB: > { %1976 = sst [smem:[#allocation4_spill]] %s1636_s27  ;;  %s33_s30 = sadd.s32 1, %s1636_s27  ;;  %s1644_s29 = sphi %s1726_s29, %s24_s29   ;;  %s1640_s28 = sphi %s1724_s28, %s1992_s28   ;;  %s1636_s27 = sphi %s1722_s27, %s1991_s27   ;;  %s1632_s26 = sphi %s1720_s26, %s1990_s26   ;;  %s1628_s25 = sphi %s1718_s25, %s1989_s25  }
   0x8   : > { %1977 = sst [smem:[#allocation5_spill]] %s1640_s28  ;;  %s36_s14 = sadd.s32 1, %s1640_s28 }
   0x9   : > { %1978 = sst [smem:[#allocation6_spill]] %s1644_s29  ;;  %p34_p0 = scmp.ge.s32.totalorder %s33_s30, 8 }
   0xa   : > { %p1450_p1 = scmp.ge.s32.totalorder %s1644_s29, 1  ;;  %p432_p2 = scmp.lt.s32.totalorder %s1644_s29, 17 }
   0xb   : > { %s1994_s30 = smov (%p34_p0, %s33_s30), 0  ;;  %s1996_s14 = smov (!%p34_p0, %s36_s14), %s1640_s28 }
   0xc   : > { %1979 = sst [smem:[#allocation7_spill]] %s1994_s30  ;;  %p433_p3 = pnand %p1450_p1, %p432_p2 }
   0xd   : > { %p38_p4 = scmp.ge.s32.totalorder %s1996_s14, 2  ;;  %p503_p5 = scmp.lt.s32.totalorder (!%p433_p3), %s1628_s25, 7 }
   0xe   : > { %436 = sbr.rel (%p433_p3) target bundleno = 552 (0x228), region = 68  ;;  %p505_p6 = scmp.lt.s32.totalorder (!%p433_p3), %s1632_s26, 1 }
   0xf   : > { %s1998_s14 = smov (%p38_p4, %s1996_s14), 0  ;;  %p1462_p7 = scmp.ne.s32.totalorder (!%p433_p3), %s1628_s25, 0 }
  0x10   : > { %1980 = sst [smem:[#allocation8_spill]] %s1998_s14 }
  0x15   : > { %s504_s15 = scalar_select %p503_p5, %s1628_s25, 7 }
  0x16   : > { %s2000_s26 = smov (!%p505_p6, %s1632_s26), 1  ;;  %vm546_vm0 = vcmask (!%p1462_p7), 261120   ;;  %vm548_vm1 = vcmask (!%p1462_p7), 253952  }
  0x17   : > { %s1551_s16 = smul.u32 10, %s504_s15  ;;  %s1457_s17 = sshll.u32 %s504_s15, 2 }
  0x18   : > { %s1550_s18 = smul.u32 5, %s2000_s26  ;;  %s1480_s19 = sshll.u32 %s2000_s26, 4 }
  0x19   : > { %s516_s22 = scalar_lea.vmem %s1952_s1, %s1480_s19  ;;  %s521_s30 = scalar_lea.vmem %s1953_s2, %s1480_s19 }
  0x1a   : > { %s509_s14 = sadd.s32 %s1551_s16, %s1550_s18  ;;  %s1456_s28 = sshll.u32 %s2000_s26, 1  ;;  %v544_v0 = vld [vmem:[%s516_s22] sm:$0xff] (!%p1462_p7)  ;;  %v545_v1 = vld [vmem:[%s516_s22 + $0x8] sm:$0x1] (!%p1462_p7) }
  0x1b   : > { %s1451_s27 = sshll.u32 %s509_s14, 3  ;;  %s528_s29 = sadd.s32 %s1457_s17, %s1456_s28  ;;  %v550_v2 = vld [vmem:[%s521_s30] sm:$0xff] (!%p1462_p7)  ;;  %547 = vst.msk [vmem:[#allocation2] sm:$0xff] (!%p1462_p7), %vm546_vm0, %v544_v0  ;;  %v551_v3 = vld [vmem:[%s521_s30 + $0x8] sm:$0x1] (!%p1462_p7) }
  0x1c   : > { %s1761_s10 = scalar_lea.vmem %s1951_s0, %s1451_s27  ;;  %s1458_s15 = sshll.u32 %s528_s29, 3  ;;  %549 = vst.msk [vmem:[#allocation2 + $0x8] sm:$0x1] (!%p1462_p7), %vm548_vm1, %v545_v1  ;;  %553 = vst.msk [vmem:[#allocation3 + $0x8] sm:$0x1] (!%p1462_p7), %vm548_vm1, %v551_v3 }
  0x1d   : > { %s1766_s8 = scalar_lea.vmem %s1963_s12, %s1458_s15  ;;  %s1771_s23 = scalar_lea.vmem %s1964_s13, %s1458_s15  ;;  %552 = vst.msk [vmem:[#allocation3] sm:$0xff] (!%p1462_p7), %vm546_vm0, %v550_v2 }
  0x1e   : > { %543 = sbr.rel (%p1462_p7) target bundleno = 37 (0x25), region = 72 }
  0x25 PF: > { %v789_v4 = vld [vmem:[%s1957_s6] sm:$0xff]  ;;  %v790_v5 = vld [vmem:[%s1957_s6 + $0x8] sm:$0xff]  ;;  %v791_v6 = vld [vmem:[%s1957_s6 + $0x10] sm:$0xff]  ;;  %vm793_vm2 = vcmask 261120   ;;  %v561_v7 = vlaneseq  ;;  %vm943_vm3 = vcmask 1043456   ;;  %s1981_s22 = sld [smem:[#allocation11_spill]] }
  0x26   : > { %v1524_v8 = vpack.c.bf16 %v790_v5, %v789_v4  ;;  %v792_v9 = vld [vmem:[%s1957_s6 + $0x18] sm:$0xff]  ;;  %v784_v10 = vld [vmem:[#allocation3] sm:$0xff]  ;;  %v1794_v14 = vld [vmem:[%s1761_s10 + $0x20] sm:$0x1f]  ;;  %v1646_v21 = vmov 1966171168  }
  0x27   : > { %v1528_v11 = vpack.c.bf16 %v792_v9, %v791_v6  ;;  %1505 = vmatprep.mubr.msk.f32.mxu0 %vm793_vm2, %v784_v10  ;;  %v1788_v12 = vld [vmem:[%s1761_s10 + $0x10] sm:$0x1f]  ;;  %v1791_v13 = vld [vmem:[%s1761_s10 + $0x18] sm:$0x1f]  ;;  %v1463_v15 = vld [vmem:[%s1954_s3 + $0x8] ss:$0 sm:$0xff]  ;;  %v1813_v22 = vunpack.c.l.s4 %v1646_v21 }
  0x28   : > { %1525 = vmatprep.subr.bf16.mxu0 %v1524_v8  ;;  %v1799_v16 = vshrl.u32 %v561_v7, 7  ;;  %v559_v17 = vld [vmem:[%s1954_s3] sm:$0xff]  ;;  %v1805_v18 = vmul.f32 %v1463_v15, %v1788_v12  ;;  %v1808_v19 = vmul.f32 %v1463_v15, %v1791_v13  ;;  %v1811_v20 = vmul.f32 %v1463_v15, %v1794_v14  ;;  %v785_v33 = vld [vmem:[#allocation3 + $0x8] sm:$0x1]  ;;  %v555_v34 = vld [vmem:[%s1761_s10 + $0x8] sm:$0x1f] }
  0x29   : > { %1527 = vmatpush3.bf16.msra.mxu0 %v1524_v8  ;;  %v788_v23 = vld [vmem:[%s1956_s5] sm:$0xf]  ;;  %s1982_s25 = sld [smem:[#allocation9_spill]]  ;;  %vm938_vm4 = vcmask 31744   ;;  %s1983_s21 = sld [smem:[#allocation10_spill]]  ;;  %vm1235_vm5 = vcmask 253952  }
  0x2a   : > { %1529 = vmatprep.subr.bf16.mxu0 %v1528_v11  ;;  %v1819_v24 = vsub.s32 0, %v1799_v16  ;;  %v570_v25 = vsub.s32 1, %v1799_v16  ;;  %v589_v26 = vsub.s32 2, %v1799_v16  ;;  %v608_v27 = vsub.s32 3, %v1799_v16  ;;  %v554_v28 = vld [vmem:[%s1761_s10] sm:$0x1f] }
  0x2b   : > { %v618_v29 = vsub.s32 4, %v1799_v16  ;;  %v637_v30 = vsub.s32 5, %v1799_v16  ;;  %v656_v31 = vsub.s32 6, %v1799_v16  ;;  %v666_v32 = vsub.s32 7, %v1799_v16  ;;  %s1984_s27 = sld [smem:[#allocation13_spill]]  ;;  %s1986_s17 = sld [smem:[#allocation14_spill]] }
  0x2c   : > { %v564_v35 = vrot.slane %v559_v17, %v1819_v24  ;;  %v571_v36 = vrot.slane %v559_v17, %v570_v25  ;;  %v590_v37 = vrot.slane %v559_v17, %v589_v26  ;;  %v609_v38 = vrot.slane %v559_v17, %v608_v27  ;;  %s1987_s19 = sld [smem:[#allocation12_spill]] }
  0x2d   : > { %1531 = vmatpush3.bf16.msra.mxu0 %v1528_v11  ;;  %v619_v39 = vrot.slane %v559_v17, %v618_v29  ;;  %v638_v40 = vrot.slane %v559_v17, %v637_v30  ;;  %v657_v41 = vrot.slane %v559_v17, %v656_v31  ;;  %v667_v42 = vrot.slane %v559_v17, %v666_v32 }
  0x2e   : > { %1508 = vmatprep.subr.msk.mxu0 %vm943_vm3, %v788_v23  ;;  %v565_v43 = vmul.f32 %v564_v35, %v554_v28  ;;  %v566_v44 = vmul.f32 %v564_v35, %v555_v34  ;;  %v567_v45 = vmul.f32 %v564_v35, %v1788_v12  ;;  %v572_v46 = vmul.f32 %v571_v36, %v554_v28 }
  0x2f   : > { %v573_v47 = vmul.f32 %v571_v36, %v555_v34  ;;  %v574_v48 = vmul.f32 %v571_v36, %v1788_v12  ;;  %v591_v49 = vmul.f32 %v590_v37, %v554_v28  ;;  %v592_v50 = vmul.f32 %v590_v37, %v555_v34 }
  0x30   : > { %1506 = vmatmul.mubr.msk.f32.vlgmr.msra.gmra.mrb[0].mxu0 %vm793_vm2, %v785_v33  ;;  %v578_v51 = vrot.slane %v572_v46, 1  ;;  %v593_v52 = vmul.f32 %v590_v37, %v1788_v12  ;;  %v610_v53 = vmul.f32 %v609_v38, %v555_v34  ;;  %v611_v54 = vmul.f32 %v609_v38, %v1788_v12 }
  0x31   : > { %1509 = vmatpush3.msk.msra.mxu0 %vm943_vm3, %v788_v23  ;;  %v579_v55 = vrot.slane %v573_v47, 1  ;;  %v580_v56 = vrot.slane %v574_v48, 1  ;;  %v597_v57 = vrot.slane %v591_v49, 2  ;;  %v598_v58 = vrot.slane %v592_v50, 2  ;;  %s1985_s30 = smov %s1984_s27 }
  0x32   : > { %v584_v59 = vadd.f32 %v578_v51, %v565_v43  ;;  %v599_v60 = vrot.slane %v593_v52, 2  ;;  %v612_v61 = vmul.f32 %v609_v38, %v1791_v13  ;;  %v620_v62 = vmul.f32 %v619_v39, %v555_v34  ;;  %v1032_v38 = vld [vmem:[%s1981_s22 + $0x8] sm:$0xff] }
  0x33   : > { %v585_v63 = vadd.f32 %v579_v55, %v566_v44  ;;  %v586_v0 = vadd.f32 %v580_v56, %v567_v45  ;;  %v621_v1 = vmul.f32 %v619_v39, %v1788_v12  ;;  %v622_v2 = vmul.f32 %v619_v39, %v1791_v13  ;;  %v1035_v39 = vld [vmem:[%s1981_s22 + $0x20] sm:$0xff] }
  0x34   : > { %v603_v3 = vadd.f32 %v597_v57, %v584_v59  ;;  %v626_v4 = vrot.slane %v620_v62, 1  ;;  %v639_v5 = vmul.f32 %v638_v40, %v555_v34  ;;  %v640_v6 = vmul.f32 %v638_v40, %v1788_v12  ;;  %v1464_v56 = vld [vmem:[%s1982_s25] ss:$0 sm:$0xff] }
  0x35   : > { %v604_v7 = vadd.f32 %v598_v58, %v585_v63  ;;  %v605_v8 = vadd.f32 %v599_v60, %v586_v0  ;;  %v627_v9 = vrot.slane %v621_v1, 1  ;;  %v628_v10 = vrot.slane %v622_v2, 1 }
  0x36   : > { %v613_v11 = vadd.f32 %v610_v53, %v603_v3  ;;  %v641_v15 = vmul.f32 %v638_v40, %v1791_v13  ;;  %v645_v17 = vrot.slane %v639_v5, 2  ;;  %v646_v21 = vrot.slane %v640_v6, 2 }
  0x37   : > { %v614_v23 = vadd.f32 %v611_v54, %v604_v7  ;;  %v615_v27 = vadd.f32 %v612_v61, %v605_v8  ;;  %v658_v28 = vmul.f32 %v657_v41, %v1788_v12  ;;  %v659_v29 = vmul.f32 %v657_v41, %v1791_v13 }
  0x38   : > { %v632_v30 = vadd.f32 %v626_v4, %v613_v11  ;;  %v647_v31 = vrot.slane %v641_v15, 2  ;;  %v660_v32 = vmul.f32 %v657_v41, %v1794_v14  ;;  %v668_v33 = vmul.f32 %v667_v42, %v1788_v12  ;;  %v1031_v12 = vld [vmem:[%s1981_s22] sm:$0xff] }
  0x39   : > { %v633_v34 = vadd.f32 %v627_v9, %v614_v23  ;;  %v634_v35 = vadd.f32 %v628_v10, %v615_v27  ;;  %v669_v36 = vmul.f32 %v667_v42, %v1791_v13  ;;  %v670_v37 = vmul.f32 %v667_v42, %v1794_v14  ;;  %v1034_v13 = vld [vmem:[%s1981_s22 + $0x18] sm:$0xff] }
  0x3a   : > { %v651_v40 = vadd.f32 %v645_v17, %v632_v30  ;;  %v674_v43 = vrot.slane %v668_v33, 1  ;;  %v717_v41 = vunpack.c.0.s8 %v1813_v22  ;;  %v693_v47 = vrot.slane %v1805_v18, 2 }
  0x3b   : > { %v652_v14 = vadd.f32 %v646_v21, %v633_v34  ;;  %v653_v42 = vadd.f32 %v647_v31, %v634_v35  ;;  %v675_v44 = vrot.slane %v669_v36, 1  ;;  %v676_v45 = vrot.slane %v670_v37, 1 }
  0x3c   : > { %v661_v46 = vadd.f32 %v658_v28, %v651_v40  ;;  %v694_v48 = vrot.slane %v1808_v19, 2  ;;  %v1532_v49 = vpack.c.bf16 %v1035_v39, %v1032_v38  ;;  %v695_v51 = vrot.slane %v1811_v20, 2  ;;  %v1038_v38 = vld [vmem:[%s1981_s22 + $0x38] sm:$0xff]  ;;  %v1041_v39 = vld [vmem:[%s1981_s22 + $0x50] sm:$0xff] }
  0x3d   : > { %v662_v50 = vadd.f32 %v659_v29, %v652_v14  ;;  %v663_v22 = vadd.f32 %v660_v32, %v653_v42  ;;  %v1534_v52 = vpack.c.bf16 %v1034_v13, %v1031_v12  ;;  %v720_v18 = vsub.s32 %v717_v41, %v1799_v16  ;;  %v1040_v41 = vld [vmem:[%s1981_s22 + $0x48] sm:$0xff]  ;;  %v1033_v13 = vld [vmem:[%s1981_s22 + $0x10] sm:$0xff] }
  0x3e   : > { %v680_v53 = vadd.f32 %v674_v43, %v661_v46  ;;  %1533 = vmatprep.subr.bf16.mxu1 %v1532_v49  ;;  %v1536_v40 = vpack.c.bf16 %v1041_v39, %v1038_v38  ;;  %v1037_v43 = vld [vmem:[%s1981_s22 + $0x30] sm:$0xff]  ;;  %v1036_v14 = vld [vmem:[%s1981_s22 + $0x28] sm:$0xff]  ;;  %v1039_v46 = vld [vmem:[%s1981_s22 + $0x40] sm:$0xff] }
  0x3f   : > { %v681_v54 = vadd.f32 %v675_v44, %v662_v50  ;;  %v682_v55 = vadd.f32 %v676_v45, %v663_v22  ;;  %1535 = vmatpush1.bf16.msra.mxu1 %v1534_v52  ;;  %v1538_v12 = vpack.c.bf16 %v1040_v41, %v1037_v43  ;;  %v1540_v42 = vpack.c.bf16 %v1036_v14, %v1033_v13  ;;  %v1470_v45 = vld [vmem:[%s1983_s21] ss:$0 sm:$0xff]  ;;  %v1231_v49 = vld [vmem:[%s1984_s27 + $0x8] sm:$0x1] }
  0x40   : > { %v699_v57 = vadd.f32 %v693_v47, %v680_v53  ;;  %1537 = vmatprep.subr.bf16.mxu1 %v1536_v40  ;;  %v1647_v44 = vmov 0.0   ;;  %v1042_v47 = vld [vmem:[%s1981_s22 + $0x58] sm:$0xff]  ;;  %v787_v40 = vld [vmem:[#allocation2 + $0x8] sm:$0x1] }
  0x41   : > { %v700_v58 = vadd.f32 %v694_v48, %v681_v54  ;;  %v701_v19 = vadd.f32 %v695_v51, %v682_v55  ;;  %1130 = vmatprep.mubr.f32.mxu1 %v1647_v44  ;;  %v1230_v51 = vld [vmem:[%s1985_s30] sm:$0xff]  ;;  %v1544_v53 = vpack.c.bf16 %v1042_v47, %v1039_v46 }
  0x42   : > { %v709_v59 = vadd.f32 %v1464_v56, %v699_v57 }
  0x43   : > { %v710_v60 = vadd.f32 %v1464_v56, %v700_v58  ;;  %v711_v61 = vadd.f32 %v1464_v56, %v701_v19  ;;  %1539 = vmatpush1.bf16.msra.mxu1 %v1538_v12 }
  0x44   : > { %v721_v62 = vrot.slane %v709_v59, %v720_v18  ;;  %1541 = vmatprep.subr.bf16.mxu1 %v1540_v42 }
  0x45   : > { %v744_v20 = vrot.slane %v710_v60, %v720_v18  ;;  %v767_v63 = vrot.slane %v711_v61, %v720_v18 }
  0x46   : > { %v722_v0 = vcombine.high %v721_v62, %v721_v62  ;;  %v729_v1 = vrot.slane %v721_v62, %v720_v18 }
  0x47   : > { %v745_v2 = vcombine.high %v744_v20, %v744_v20  ;;  %v752_v3 = vrot.slane %v744_v20, %v720_v18  ;;  %v768_v4 = vcombine.high %v767_v63, %v767_v63  ;;  %v775_v5 = vrot.slane %v767_v63, %v720_v18  ;;  %v1244_v20 = vld [vmem:[%s1986_s17] sm:$0x1] }
  0x48   : > { %v736_v6 = vrot.slane %v722_v0, %v720_v18  ;;  %v737_v7 = vcombine.high %v729_v1, %v729_v1 }
  0x49   : > { %v759_v8 = vrot.slane %v745_v2, %v720_v18  ;;  %v760_v9 = vcombine.high %v752_v3, %v752_v3  ;;  %v782_v10 = vrot.slane %v768_v4, %v720_v18  ;;  %v783_v17 = vcombine.high %v775_v5, %v775_v5 }
  0x4a   : > { %v875_v11 = vcombine.low %v729_v1, %v736_v6  ;;  %v876_v15 = vcombine.low %v737_v7, %v752_v3  ;;  %v1043_v3 = vld [vmem:[%s1987_s19] sm:$0x7] }
  0x4b   : > { %v877_v21 = vcombine.low %v759_v8, %v760_v9  ;;  %v878_v23 = vcombine.low %v775_v5, %v782_v10  ;;  %v930_v32 = vrot.slane %v783_v17, %v720_v18  ;;  %v1048_v4 = vrot.slane %v1043_v3, %v1819_v24 }
  0x4c   : > { %v885_v27 = vrot.slane %v875_v11, %v720_v18  ;;  %v892_v28 = vrot.slane %v876_v15, %v720_v18  ;;  %v1052_v5 = vrot.slane %v1043_v3, %v570_v25 }
  0x4d   : > { %v899_v29 = vrot.slane %v877_v21, %v720_v18  ;;  %v906_v30 = vrot.slane %v878_v23, %v720_v18  ;;  %v937_v36 = vrot.slane %v930_v32, %v720_v18 }
  0x4e   : > { %v907_v31 = vcombine.low %v885_v27, %v892_v28 }
  0x4f   : > { %v908_v33 = vcombine.low %v899_v29, %v906_v30 }
  0x50   : > { %v915_v34 = vrot.slane %v907_v31, %v720_v18 }
  0x51   : > { %v922_v35 = vrot.slane %v908_v33, %v720_v18 }
  0x53   : > { %v923_v37 = vcombine.low %v915_v34, %v922_v35 }
  0x55   : > { %1510 = vmatprep.mubr.msk.f32.mxu0 %vm938_vm4, %v923_v37 }
  0x56   : > { %1511 = vmatmul.mubr.msk.f32.vlgmr.msra.gmra.mrb[0].mxu0 %vm938_vm4, %v937_v36  ;;  %v786_v36 = vld [vmem:[#allocation2] sm:$0xff] }
 0x129   : > { %v1512_v48 = vpop.f32.mrb[0].mxu0 }
 0x12a   : > { %v1030_v50 = vadd.f32 %v1512_v48, %v1470_v45  ;;  %v1013_v22 = vpop.f32.mrb[1].mxu0 }
 0x12b   : > { %v1029_v52 = vadd.f32 %v1470_v45, %v1013_v22 }
 0x12c   : > { %v1233_v54 = vmul.f32 %v1231_v49, %v1030_v50 }
 0x12d   : > { %v1232_v55 = vmul.f32 %v1230_v51, %v1029_v52  ;;  %1471 = vmatmul.mubr.msk.f32.vlgmr.msra.gmra.mrb[0].mxu1 %vm793_vm2, %v1029_v52 }
 0x12e   : > { %v1236_v56 = vsel %vm1235_vm5, %v1233_v54, 0.0  ;;  %1543 = vmatpush3.bf16.msra.mxu1 %v1540_v42  ;;  %1136 = vmatprep.mubr.f32.mxu1 %v1647_v44 }
 0x12f   : > { %v1234_v57 = vsel %vm793_vm2, %v1232_v55, 0.0  ;;  %1545 = vmatprep.subr.bf16.mxu1 %v1544_v53 }
 0x130   : > { %v1237_v18 = vadd.f32 %v1236_v56, %v1234_v57 }
 0x131   : > { %1472 = vmatmul.mubr.msk.f32.gmra.mrb[2].mxu1 %vm793_vm2, %v1030_v50 }
 0x132   : > { %1547 = vmatpush3.bf16.msra.mxu1 %v1544_v53  ;;  %1521 = vmatprep.mubr.msk.f32.mxu1 %vm793_vm2, %v1029_v52  ;;  %v1238_v58 = vrot.slane %v1237_v18, 4 }
 0x134   : > { %v1239_v19 = vadd.f32 %v1238_v58, %v1237_v18 }
 0x135   : > { %1522 = vmatmul.mubr.msk.f32.vlgmr.msra.gmra.mrb[4].mxu1 %vm793_vm2, %v1030_v50 }
 0x136   : > { %v1240_v59 = vrot.slane %v1239_v19, 2 }
 0x138   : > { %v1241_v60 = vadd.f32 %v1240_v59, %v1239_v19 }
 0x13a   : > { %v1242_v61 = vrot.slane %v1241_v60, 1 }
 0x13c   : > { %v1243_v62 = vadd.f32 %v1242_v61, %v1241_v60 }
 0x13e   : > { %v1245_v63 = vadd.f32 %v1244_v20, %v1243_v62 }
 0x140   : > { %v1477_v0 = vmul.f32 -1.442695, %v1245_v63 }
 0x142   : > { %1594 = vpow2.f32 %v1477_v0 }
 0x14c   : > { %v1595_v1 = vpop.eup %1594 }
 0x14d   : > { %v1249_v2 = vadd.f32 1.0, %v1595_v1 }
 0x14f   : > { %1596 = vrcp.f32 %v1249_v2 }
 0x159   : > { %v1597_v6 = vpop.eup %1596 }
 0x15a   : > { %v1257_v11 = vrot.slane %v1597_v6, %v1819_v24  ;;  %v1056_v24 = vrot.slane %v1043_v3, %v589_v26 }
 0x200   : > { %v1132_v7 = vpop.f32.mrb[0].mxu1 }
 0x201   : > { %v1133_v8 = vadd.f32 %v1132_v7, %v1048_v4  ;;  %v1134_v9 = vpop.f32.mrb[1].mxu1 }
 0x202   : > { %v1135_v10 = vadd.f32 %v1134_v9, %v1052_v5 }
 0x203   : > { %v1475_v15 = vmul.f32 -1.442695, %v1133_v8 }
 0x204   : > { %v1258_v17 = vmul.f32 %v1257_v11, %v1135_v10  ;;  %v1138_v21 = vpop.f32.mrb[2].mxu1 }
 0x205   : > { %1598 = vpow2.f32 %v1475_v15  ;;  %v1139_v23 = vadd.f32 %v1138_v21, %v1048_v4  ;;  %v1140_v27 = vpop.f32.mrb[3].mxu1 }
 0x206   : > { %v1141_v28 = vadd.f32 %v1140_v27, %v1052_v5 }
 0x207   : > { %v1476_v29 = vmul.f32 -1.442695, %v1139_v23 }
 0x208   : > { %v1259_v30 = vmul.f32 %v1257_v11, %v1141_v28  ;;  %v1523_v31 = vpop.f32.mrb[4].mxu1 }
 0x209   : > { %1600 = vpow2.f32 %v1476_v29  ;;  %v1209_v32 = vpop.f32.mrb[5].mxu1  ;;  %v1215_v41 = vadd.f32 %v1523_v31, %v1056_v24 }
 0x20a   : > { %v1210_v37 = vadd.f32 %v1209_v32, %v1056_v24 }
 0x20b   : > { %v1263_v26 = vmax.f32 %v1215_v41, 0.0 }
 0x20c   : > { %v1262_v12 = vmax.f32 %v1210_v37, 0.0 }
 0x20f   : > { %v1599_v25 = vpop.eup %1598 }
 0x210   : > { %v1224_v33 = vadd.f32 1.0, %v1599_v25 }
 0x212   : > { %1602 = vrcp.f32 %v1224_v33 }
 0x213   : > { %v1601_v34 = vpop.eup %1600 }
 0x214   : > { %v1225_v35 = vadd.f32 1.0, %v1601_v34 }
 0x216   : > { %1604 = vrcp.f32 %v1225_v35 }
 0x21c   : > { %v1603_v38 = vpop.eup %1602 }
 0x21d   : > { %v1252_v39 = vmul.f32 %v1603_v38, %v786_v36 }
 0x21f   : > { %v1260_v43 = vadd.f32 %v1258_v17, %v1252_v39 }
 0x220   : > { %v1605_v13 = vpop.eup %1604 }
 0x221   : > { %1266 = vst.msk [vmem:[#allocation2] sm:$0xff] %vm793_vm2, %v1260_v43  ;;  %1270 = vst.msk [vmem:[%s1766_s8] sm:$0xff] %vm793_vm2, %v1260_v43  ;;  %v1253_v14 = vmul.f32 %v1605_v13, %v787_v40  ;;  %v1264_v42 = vmul.f32 %v1262_v12, %v1260_v43 }
 0x223   : > { %v1261_v16 = vadd.f32 %v1259_v30, %v1253_v14  ;;  %1268 = vst.msk [vmem:[#allocation3] sm:$0xff] %vm793_vm2, %v1264_v42  ;;  %1272 = vst.msk [vmem:[%s1771_s23] sm:$0xff] %vm793_vm2, %v1264_v42 }
 0x225   : > { %1267 = vst.msk [vmem:[#allocation2 + $0x8] sm:$0x1] %vm1235_vm5, %v1261_v16  ;;  %1271 = vst.msk [vmem:[%s1766_s8 + $0x8] sm:$0x1] %vm1235_vm5, %v1261_v16  ;;  %v1265_v44 = vmul.f32 %v1263_v26, %v1261_v16 }
 0x227   : > { %1269 = vst.msk [vmem:[#allocation3 + $0x8] sm:$0x1] %vm1235_vm5, %v1265_v44  ;;  %1273 = vst.msk [vmem:[%s1771_s23 + $0x8] sm:$0x1] %vm1235_vm5, %v1265_v44 }
 0x228 PF: > { %s1988_s24 = sld [smem:[#allocation6_spill]]  ;;  %s1989_s25 = sld [smem:[#allocation4_spill]] }
 0x229   : > { %s1990_s26 = sld [smem:[#allocation5_spill]]  ;;  %s1991_s27 = sld [smem:[#allocation7_spill]] }
 0x22a   : > { %s1992_s28 = sld [smem:[#allocation8_spill]] }
 0x22e   : > { %s24_s29 = sadd.s32 1, %s1988_s24  }
 0x22f   : > { %p21_p8 = scmp.ge.s32.totalorder %s24_s29, 18  }
 0x231   :  { %23 = sbr.rel (!%p21_p8) target bundleno = 7 (0x7), region = 120 }

</bundles_post_ra>
